<compile_context>
chip_gen: v7x
topology: tpu7x:2x2x1
jax: 0.10.0
libtpu: 0.0.40
codegen_flags: <defaults>
</compile_context>

<pallas_src>
import functools

import numpy as np
import jax
import jax.numpy as jnp
from jax.experimental import pallas as pl
from jax.experimental.pallas import tpu as pltpu


# ----------------------------------------------------------------------------------
# Pallas kernel: pairwise IoU mask + exact greedy suppression on score-sorted candidates
# ----------------------------------------------------------------------------------
def _nms_keep_kernel(nvalid_ref, rows_ref, cols_ref, o_ref, iou_ref, *, M, iou_thres):
    # nvalid_ref: (B,) int32 in SMEM (scalar prefetch) -- # of valid candidates / image.
    # rows_ref:   (1, 8, M)  rows 0..3 = x1,y1,x2,y2 (class-offset boxes), 4 = area,
    #                        5 = valid (0/1), 6..7 = zero padding. Lane dim = candidate.
    # cols_ref:   (1, M, 8)  same data transposed (candidate on sublanes) so the
    #                        (M, M) IoU matrix is built with pure broadcasts (no
    #                        in-kernel transpose).
    # o_ref:      (1, 8, M)  keep mask broadcast over 8 sublanes (lane-dense full-tile
    #                        store).
    # iou_ref:    (M, M)     VMEM scratch holding the thresholded IoU mask.
    r = rows_ref[0]                                   # (8, M)
    c = cols_ref[0]                                   # (M, 8)

    x1r, y1r = r[0:1, :], r[1:2, :]                   # (1, M)  box j along lanes
    x2r, y2r = r[2:3, :], r[3:4, :]
    area_r = r[4:5, :]
    valid = r[5:6, :]                                 # (1, M)  0/1

    x1c, y1c = c[:, 0:1], c[:, 1:2]                   # (M, 1)  box i along sublanes
    x2c, y2c = c[:, 2:3], c[:, 3:4]
    area_c = c[:, 4:5]

    # Pairwise "IoU > thr" mask (M, M): element [i, j] = IoU(box_i, box_j) > iou_thres,
    # evaluated as inter > thr * union (no divide; matches the reference decision,
    # including degenerate 0/0 -> False).
    iw = jnp.maximum(jnp.minimum(x2c, x2r) - jnp.maximum(x1c, x1r), 0.0)
    ih = jnp.maximum(jnp.minimum(y2c, y2r) - jnp.maximum(y1c, y1r), 0.0)
    inter = iw * ih
    union = area_c + area_r - inter
    iou_ref[...] = (inter > iou_thres * union).astype(jnp.float32)

    lane = jax.lax.broadcasted_iota(jnp.int32, (1, M), 1)
    n = nvalid_ref[pl.program_id(0)]                  # dynamic loop bound (SMEM scalar)

    # Greedy NMS over candidates already sorted by descending score.
    #   alive[j] = candidate j is valid and not yet suppressed
    #   at step i: if alive[i], keep it and kill every j with IoU(i, j) > thr.
    # Candidates >= n are invalid (padded / below conf), so skipping them is exact.
    def body(i, carry):
        alive, keep = carry                           # each (1, M) f32 in {0, 1}
        onehot = (lane == i).astype(jnp.float32)      # (1, M)
        a_i = jnp.sum(alive * onehot, keepdims=True)  # (1, 1) scalar: keep candidate i?
        keep = keep + a_i * onehot
        row = iou_ref[pl.ds(i, 1), :]                 # (1, M) thresholded IoU row of i
        alive = alive * (1.0 - a_i * row)             # row[i] == 1 -> i also retired
        return alive, keep

    keep0 = jnp.zeros((1, M), jnp.float32)
    _, keep = jax.lax.fori_loop(0, n, body, (valid, keep0))

    o_ref[0] = jnp.broadcast_to(keep, (8, M))         # full-tile, lane-dense store


def _nms_keep_pallas(nvalid, rows, cols, *, iou_thres):
    B, _, M = rows.shape
    kernel = functools.partial(_nms_keep_kernel, M=M, iou_thres=float(iou_thres))
    keep8 = pl.pallas_call(
        kernel,
        out_shape=jax.ShapeDtypeStruct((B, 8, M), jnp.float32),
        grid_spec=pltpu.PrefetchScalarGridSpec(
            num_scalar_prefetch=1,                    # per-image valid counts -> SMEM
            grid=(B,),
            in_specs=[
                pl.BlockSpec((1, 8, M), lambda b, nv: (b, 0, 0)),
                pl.BlockSpec((1, M, 8), lambda b, nv: (b, 0, 0)),
            ],
            out_specs=pl.BlockSpec((1, 8, M), lambda b, nv: (b, 0, 0)),
            scratch_shapes=[pltpu.VMEM((M, M), jnp.float32)],
        ),
        compiler_params=pltpu.CompilerParams(
            dimension_semantics=("parallel",)),       # batch axis shards across TCs (v7x)
    )(nvalid, rows, cols)
    return keep8[:, 0, :]                             # (B, M) keep mask in {0, 1}


# ----------------------------------------------------------------------------------
# Wrapper: full non_max_suppression forward (fixed-shape output + per-image count)
# ----------------------------------------------------------------------------------
def non_max_suppression_tpu(prediction, conf_thres=0.25, iou_thres=0.45,
                            max_det=300, max_wh=4096.0, max_nms=1024):
    """prediction: (B, N, 5+nc). Returns (det (B, K, 6), counts (B,)) with
    det rows = [x1, y1, x2, y2, conf, cls] sorted by descending confidence."""
    prediction = prediction.astype(jnp.float32)
    B, N, no = prediction.shape
    nc = no - 5

    # xywh -> xyxy
    cx, cy = prediction[..., 0], prediction[..., 1]
    w, h = prediction[..., 2], prediction[..., 3]
    x1, y1 = cx - w * 0.5, cy - h * 0.5
    x2, y2 = cx + w * 0.5, cy + h * 0.5

    obj = prediction[..., 4]                                    # (B, N)
    cls_scores = prediction[..., 5:] * obj[..., None]           # (B, N, nc)

    # multi-label candidate expansion (matches torch multi_label path; identical to the
    # single-label path when nc == 1).
    valid = (obj[..., None] > conf_thres) & (cls_scores > conf_thres)   # (B, N, nc)

    M0 = N * nc
    score = cls_scores.reshape(B, M0)
    valid = valid.reshape(B, M0)
    cls_f = jnp.broadcast_to(
        jnp.arange(nc, dtype=jnp.float32)[None, None, :], (B, N, nc)).reshape(B, M0)

    def rep(a):                                                 # (B, N) -> (B, N*nc)
        return jnp.broadcast_to(a[:, :, None], (B, N, nc)).reshape(B, M0)

    bx1, by1, bx2, by2 = rep(x1), rep(y1), rep(x2), rep(y2)
    off = cls_f * max_wh                                        # agnostic=False class offset
    ox1, oy1, ox2, oy2 = bx1 + off, by1 + off, bx2 + off, by2 + off

    # Candidate slots handed to the kernel: padded to a multiple of 128 (lane-dense
    # tiles) and capped at max_nms (mirrors torch's max_nms truncation; keeps the
    # (M, M) VMEM scratch bounded).
    M = max(128, ((min(M0, max_nms) + 127) // 128) * 128)

    arrays = [ox1, oy1, ox2, oy2, bx1, by1, bx2, by2, score, cls_f,
              valid.astype(jnp.float32)]
    if M0 < M:                                                  # pad candidate pool
        pad = M - M0
        arrays = [jnp.pad(a, ((0, 0), (0, pad))) for a in arrays]
        valid_p = jnp.pad(valid, ((0, 0), (0, pad)))
    else:
        valid_p = valid
    (ox1, oy1, ox2, oy2, bx1, by1, bx2, by2, score, cls_f, valid_f) = arrays

    # top-M candidates by descending score (invalid pushed to the back with key = -1).
    key = jnp.where(valid_p, score, -1.0)
    _, order = jax.lax.top_k(key, M)                            # (B, M) sorted desc
    g = lambda a: jnp.take_along_axis(a, order, axis=1)
    s_ox1, s_oy1, s_ox2, s_oy2 = g(ox1), g(oy1), g(ox2), g(oy2)
    s_bx1, s_by1, s_bx2, s_by2 = g(bx1), g(by1), g(bx2), g(by2)
    s_score, s_cls, s_valid = g(score), g(cls_f), g(valid_f)

    # per-image valid-candidate count -> dynamic loop bound inside the kernel
    nvalid = jnp.minimum(jnp.sum(valid_p.astype(jnp.int32), axis=1),
                         jnp.int32(M)).astype(jnp.int32)        # (B,)

    area = (s_ox2 - s_ox1) * (s_oy2 - s_oy1)
    zeros = jnp.zeros_like(area)
    rows = jnp.stack([s_ox1, s_oy1, s_ox2, s_oy2, area, s_valid, zeros, zeros], axis=1)
    cols = jnp.transpose(rows, (0, 2, 1))                       # (B, M, 8)

    keep = _nms_keep_pallas(nvalid, rows, cols, iou_thres=iou_thres) > 0.5   # (B, M)

    # gather kept detections (already in descending-score order), cap at max_det
    K = int(min(max_det, M))
    pos = jnp.where(keep, jnp.arange(M, dtype=jnp.int32)[None, :], jnp.int32(M))
    sel = jnp.sort(pos, axis=1)[:, :K]                          # (B, K)
    valid_det = sel < M
    sel_c = jnp.minimum(sel, M - 1)
    gat = lambda a: jnp.take_along_axis(a, sel_c, axis=1)
    det = jnp.stack([gat(s_bx1), gat(s_by1), gat(s_bx2), gat(s_by2),
                     gat(s_score), gat(s_cls)], axis=-1)        # (B, K, 6)
    det = jnp.where(valid_det[..., None], det, 0.0)
    counts = jnp.minimum(jnp.sum(keep, axis=1), K).astype(jnp.int32)
    return det, counts
    # TODO(synk): `classes` filtering, `labels` injection and the `merge` branch of
    # non_max_suppression use their defaults (None / () / False) and are not implemented;
    # candidate pools larger than max_nms would need a tiled (cross-block) NMS kernel to
    # match torch's max_nms=30000; the variable-length list output of the torch module is
    # returned as a fixed (B, K, 6) tensor plus a per-image count.


def nms_forward(x, conf=0.25, iou=0.45):
    """Mirrors NMS.forward: operates on x[0]."""
    return non_max_suppression_tpu(x[0], conf_thres=conf, iou_thres=iou)


# ----------------------------------------------------------------------------------
# Numpy reference (direct port of the torch non_max_suppression semantics)
# ----------------------------------------------------------------------------------
def _reference_nms_np(prediction, conf_thres=0.25, iou_thres=0.45, max_det=300,
                      max_wh=4096.0):
    prediction = np.asarray(prediction, np.float32)
    B, N, no = prediction.shape
    nc = no - 5
    outputs = []
    for b in range(B):
        x = prediction[b]
        x = x[x[:, 4] > conf_thres]
        if x.shape[0] == 0:
            outputs.append(np.zeros((0, 6), np.float32))
            continue
        x = x.copy()
        x[:, 5:] *= x[:, 4:5]
        box = np.stack([x[:, 0] - x[:, 2] / 2, x[:, 1] - x[:, 3] / 2,
                        x[:, 0] + x[:, 2] / 2, x[:, 1] + x[:, 3] / 2], 1)
        if nc > 1:
            i, j = np.nonzero(x[:, 5:] > conf_thres)
            det = np.concatenate(
                [box[i], x[i, j + 5, None], j[:, None].astype(np.float32)], 1)
        else:
            conf = x[:, 5:].max(1, keepdims=True)
            j = x[:, 5:].argmax(1, keepdims=True).astype(np.float32)
            det = np.concatenate([box, conf, j], 1)[conf.reshape(-1) > conf_thres]
        if det.shape[0] == 0:
            outputs.append(np.zeros((0, 6), np.float32))
            continue
        c = det[:, 5:6] * max_wh
        boxes = det[:, :4] + c
        scores = det[:, 4]
        order = np.argsort(-scores)
        boxes_s, det_s = boxes[order], det[order]
        areas = (boxes_s[:, 2] - boxes_s[:, 0]) * (boxes_s[:, 3] - boxes_s[:, 1])
        n = boxes_s.shape[0]
        suppressed = np.zeros(n, bool)
        kept = []
        for i in range(n):
            if suppressed[i]:
                continue
            kept.append(det_s[i])
            if len(kept) >= max_det:
                break
            xx1 = np.maximum(boxes_s[i, 0], boxes_s[:, 0])
            yy1 = np.maximum(boxes_s[i, 1], boxes_s[:, 1])
            xx2 = np.minimum(boxes_s[i, 2], boxes_s[:, 2])
            yy2 = np.minimum(boxes_s[i, 3], boxes_s[:, 3])
            inter = np.maximum(xx2 - xx1, 0) * np.maximum(yy2 - yy1, 0)
            iou = inter / (areas[i] + areas - inter)
            suppressed |= iou > iou_thres
        outputs.append(np.stack(kept, 0) if kept else np.zeros((0, 6), np.float32))
    return outputs


if __name__ == "__main__":
    # Small shapes consistent with the module: batch=2, 32 raw predictions, 4 classes
    # -> prediction shape (2, 32, 9); candidate count 32*4 = 128 (one full lane tile).
    B, N, NC = 2, 32, 4
    key = jax.random.PRNGKey(0)
    kxy, kwh, kobj, kcls = jax.random.split(key, 4)
    xy = jax.random.uniform(kxy, (B, N, 2), jnp.float32, 40.0, 600.0)    # box centers
    wh = jax.random.uniform(kwh, (B, N, 2), jnp.float32, 10.0, 120.0)    # box sizes
    obj = jax.random.uniform(kobj, (B, N, 1), jnp.float32, 0.0, 1.0)     # objectness
    cls = jax.random.uniform(kcls, (B, N, NC), jnp.float32, 0.0, 1.0)    # class scores
    prediction = jnp.concatenate([xy, wh, obj, cls], axis=-1)            # (B, N, 5+NC)

    fwd = jax.jit(lambda p: nms_forward((p,)))
    det, counts = fwd(prediction)
    det = jax.block_until_ready(det)
    counts = jax.block_until_ready(counts)

    ref = _reference_nms_np(np.asarray(prediction))
    det_np = np.asarray(det)
    for b in range(B):
        n = int(counts[b])
        rb = ref[b]
        assert n == rb.shape[0], f"batch {b}: count {n} vs reference {rb.shape[0]}"
        if n:
            assert np.allclose(det_np[b, :n], rb, atol=1e-3, rtol=1e-3), (
                f"batch {b}: max err {np.max(np.abs(det_np[b, :n] - rb))}")

    print("KERNEL_OK")
</pallas_src>

<mosaic_0001>
module attributes {stable_mosaic.version = 11 : i64} {
  func.func @_nms_keep_kernel(%arg0: i32, %arg1: memref<2xi32, #tpu.memory_space<smem>>, %arg2: memref<1x8x128xf32, #tpu.memory_space<vmem>>, %arg3: memref<1x128x8xf32, #tpu.memory_space<vmem>>, %arg4: memref<1x8x128xf32, #tpu.memory_space<vmem>>, %arg5: memref<128x128xf32, #tpu.memory_space<vmem>>) attributes {dimension_semantics = [#tpu.dimension_semantics<parallel>], iteration_bounds = array<i64: 2>, scalar_prefetch = 1 : i64, scratch_operands = 1 : i64, tpu.core_type = #tpu.core_type<tc>, window_params = [{transform_indices = @transform_0, window_bounds = array<i64: 1, 8, 128>}, {transform_indices = @transform_1, window_bounds = array<i64: 1, 128, 8>}, {transform_indices = @transform_2, window_bounds = array<i64: 1, 8, 128>}]} {
    %c0 = arith.constant 0 : index
    %c0_0 = arith.constant 0 : index
    %c0_1 = arith.constant 0 : index
    %0 = vector.load %arg2[%c0, %c0_0, %c0_1] : memref<1x8x128xf32, #tpu.memory_space<vmem>>, vector<1x8x128xf32>
    %1 = vector.shape_cast %0 : vector<1x8x128xf32> to vector<8x128xf32>
    %c0_2 = arith.constant 0 : index
    %c0_3 = arith.constant 0 : index
    %c0_4 = arith.constant 0 : index
    %2 = vector.load %arg3[%c0_2, %c0_3, %c0_4] : memref<1x128x8xf32, #tpu.memory_space<vmem>>, vector<1x128x8xf32>
    %3 = vector.shape_cast %2 : vector<1x128x8xf32> to vector<128x8xf32>
    %4 = vector.extract_strided_slice %1 {offsets = [0, 0], sizes = [1, 128], strides = [1, 1]} : vector<8x128xf32> to vector<1x128xf32>
    %5 = vector.extract_strided_slice %1 {offsets = [1, 0], sizes = [1, 128], strides = [1, 1]} : vector<8x128xf32> to vector<1x128xf32>
    %6 = vector.extract_strided_slice %1 {offsets = [2, 0], sizes = [1, 128], strides = [1, 1]} : vector<8x128xf32> to vector<1x128xf32>
    %7 = vector.extract_strided_slice %1 {offsets = [3, 0], sizes = [1, 128], strides = [1, 1]} : vector<8x128xf32> to vector<1x128xf32>
    %8 = vector.extract_strided_slice %1 {offsets = [4, 0], sizes = [1, 128], strides = [1, 1]} : vector<8x128xf32> to vector<1x128xf32>
    %9 = vector.extract_strided_slice %1 {offsets = [5, 0], sizes = [1, 128], strides = [1, 1]} : vector<8x128xf32> to vector<1x128xf32>
    %10 = vector.extract_strided_slice %3 {offsets = [0, 0], sizes = [128, 1], strides = [1, 1]} : vector<128x8xf32> to vector<128x1xf32>
    %11 = vector.extract_strided_slice %3 {offsets = [0, 1], sizes = [128, 1], strides = [1, 1]} : vector<128x8xf32> to vector<128x1xf32>
    %12 = vector.extract_strided_slice %3 {offsets = [0, 2], sizes = [128, 1], strides = [1, 1]} : vector<128x8xf32> to vector<128x1xf32>
    %13 = vector.extract_strided_slice %3 {offsets = [0, 3], sizes = [128, 1], strides = [1, 1]} : vector<128x8xf32> to vector<128x1xf32>
    %14 = vector.extract_strided_slice %3 {offsets = [0, 4], sizes = [128, 1], strides = [1, 1]} : vector<128x8xf32> to vector<128x1xf32>
    %15 = vector.broadcast %12 : vector<128x1xf32> to vector<128x128xf32>
    %16 = vector.broadcast %6 : vector<1x128xf32> to vector<128x128xf32>
    %17 = arith.minimumf %15, %16 : vector<128x128xf32>
    %18 = vector.broadcast %10 : vector<128x1xf32> to vector<128x128xf32>
    %19 = vector.broadcast %4 : vector<1x128xf32> to vector<128x128xf32>
    %20 = arith.maximumf %18, %19 : vector<128x128xf32>
    %21 = arith.subf %17, %20 : vector<128x128xf32>
    %cst = arith.constant 0.000000e+00 : f32
    %22 = vector.broadcast %cst : f32 to vector<128x128xf32>
    %23 = arith.maximumf %21, %22 : vector<128x128xf32>
    %24 = vector.broadcast %13 : vector<128x1xf32> to vector<128x128xf32>
    %25 = vector.broadcast %7 : vector<1x128xf32> to vector<128x128xf32>
    %26 = arith.minimumf %24, %25 : vector<128x128xf32>
    %27 = vector.broadcast %11 : vector<128x1xf32> to vector<128x128xf32>
    %28 = vector.broadcast %5 : vector<1x128xf32> to vector<128x128xf32>
    %29 = arith.maximumf %27, %28 : vector<128x128xf32>
    %30 = arith.subf %26, %29 : vector<128x128xf32>
    %cst_5 = arith.constant 0.000000e+00 : f32
    %31 = vector.broadcast %cst_5 : f32 to vector<128x128xf32>
    %32 = arith.maximumf %30, %31 : vector<128x128xf32>
    %33 = arith.mulf %23, %32 : vector<128x128xf32>
    %34 = vector.broadcast %14 : vector<128x1xf32> to vector<128x128xf32>
    %35 = vector.broadcast %8 : vector<1x128xf32> to vector<128x128xf32>
    %36 = arith.addf %34, %35 : vector<128x128xf32>
    %37 = arith.subf %36, %33 : vector<128x128xf32>
    %cst_6 = arith.constant 4.500000e-01 : f32
    %38 = vector.broadcast %cst_6 : f32 to vector<128x128xf32>
    %39 = arith.mulf %38, %37 : vector<128x128xf32>
    %40 = arith.cmpf ogt, %33, %39 : vector<128x128xf32>
    %41 = arith.extui %40 : vector<128x128xi1> to vector<128x128xi32>
    %42 = arith.sitofp %41 : vector<128x128xi32> to vector<128x128xf32>
    %c0_7 = arith.constant 0 : index
    %c0_8 = arith.constant 0 : index
    %43 = vector.load %arg5[%c0_7, %c0_8] : memref<128x128xf32, #tpu.memory_space<vmem>>, vector<128x128xf32>
    tpu.vector_store %arg5[%c0_7, %c0_8], %42 {strides = array<i32>} : memref<128x128xf32, #tpu.memory_space<vmem>>, vector<128x128xf32>,
    %44 = tpu.iota {dimensions = array<i32: 1>} : vector<1x128xi32>
    %45 = arith.index_cast %arg0 : i32 to index
    %46 = memref.load %arg1[%45] : memref<2xi32, #tpu.memory_space<smem>>
    %cst_9 = arith.constant 0.000000e+00 : f32
    %47 = vector.broadcast %cst_9 : f32 to vector<1x128xf32>
    %c0_i32 = arith.constant 0 : i32
    %48 = arith.subi %46, %c0_i32 : i32
    %49 = arith.addi %c0_i32, %48 : i32
    %c1_i32 = arith.constant 1 : i32
    %50:2 = scf.for %arg6 = %c0_i32 to %49 step %c1_i32 iter_args(%arg7 = %9, %arg8 = %47) -> (vector<1x128xf32>, vector<1x128xf32>)  : i32 {
      %56 = vector.broadcast %arg6 : i32 to vector<1x128xi32>
      %57 = arith.cmpi eq, %44, %56 : vector<1x128xi32>
      %58 = arith.extui %57 : vector<1x128xi1> to vector<1x128xi32>
      %59 = arith.sitofp %58 : vector<1x128xi32> to vector<1x128xf32>
      %60 = arith.mulf %arg7, %59 : vector<1x128xf32>
      %61 = vector.shape_cast %60 : vector<1x128xf32> to vector<1x1x128xf32>
      %cst_13 = arith.constant dense<0.000000e+00> : vector<1xf32>
      %62 = vector.multi_reduction <add>, %61, %cst_13 [1, 2] : vector<1x1x128xf32> to vector<1xf32>
      %63 = vector.shape_cast %62 : vector<1xf32> to vector<1x1x1xf32>
      %64 = vector.extract %63[0, 0, 0] : f32 from vector<1x1x1xf32>
      %65 = vector.broadcast %64 : f32 to vector<1x1xf32>
      %66 = vector.broadcast %65 : vector<1x1xf32> to vector<1x128xf32>
      %67 = arith.mulf %66, %59 : vector<1x128xf32>
      %68 = arith.addf %arg8, %67 : vector<1x128xf32>
      %69 = arith.index_cast %arg6 : i32 to index
      %c0_14 = arith.constant 0 : index
      %70 = vector.load %arg5[%69, %c0_14] : memref<128x128xf32, #tpu.memory_space<vmem>>, vector<1x128xf32>
      %71 = vector.broadcast %65 : vector<1x1xf32> to vector<1x128xf32>
      %72 = arith.mulf %71, %70 : vector<1x128xf32>
      %cst_15 = arith.constant 1.000000e+00 : f32
      %73 = vector.broadcast %cst_15 : f32 to vector<1x128xf32>
      %74 = arith.subf %73, %72 : vector<1x128xf32>
      %75 = arith.mulf %arg7, %74 : vector<1x128xf32>
      scf.yield %75, %68 : vector<1x128xf32>, vector<1x128xf32>
    }
    %51 = vector.shape_cast %50#1 : vector<1x128xf32> to vector<1x128xf32>
    %52 = vector.broadcast %51 : vector<1x128xf32> to vector<8x128xf32>
    %c0_10 = arith.constant 0 : index
    %c0_11 = arith.constant 0 : index
    %c0_12 = arith.constant 0 : index
    %53 = vector.load %arg4[%c0_10, %c0_11, %c0_12] : memref<1x8x128xf32, #tpu.memory_space<vmem>>, vector<1x8x128xf32>
    %54 = vector.shape_cast %53 : vector<1x8x128xf32> to vector<8x128xf32>
    %55 = vector.shape_cast %52 : vector<8x128xf32> to vector<1x8x128xf32>
    tpu.vector_store %arg4[%c0_10, %c0_11, %c0_12], %55 {strides = array<i32>} : memref<1x8x128xf32, #tpu.memory_space<vmem>>, vector<1x8x128xf32>,
    return
  }
  func.func @transform_0(%arg0: i32, %arg1: memref<2xi32, #tpu.memory_space<smem>>) -> (i32, i32, i32) {
    %c0_i32 = arith.constant 0 : i32
    %c0_i32_0 = arith.constant 0 : i32
    %c0_i32_1 = arith.constant 0 : i32
    return %arg0, %c0_i32, %c0_i32_0 : i32, i32, i32
  }
  func.func @transform_1(%arg0: i32, %arg1: memref<2xi32, #tpu.memory_space<smem>>) -> (i32, i32, i32) {
    %c0_i32 = arith.constant 0 : i32
    %c0_i32_0 = arith.constant 0 : i32
    %c0_i32_1 = arith.constant 0 : i32
    return %arg0, %c0_i32, %c0_i32_0 : i32, i32, i32
  }
  func.func @transform_2(%arg0: i32, %arg1: memref<2xi32, #tpu.memory_space<smem>>) -> (i32, i32, i32) {
    %c0_i32 = arith.constant 0 : i32
    %c0_i32_0 = arith.constant 0 : i32
    %c0_i32_1 = arith.constant 0 : i32
    return %arg0, %c0_i32, %c0_i32_0 : i32, i32, i32
  }
}

</mosaic_0001>

<bundles_post_ra>
// kernel: _lambda_.1
= control target key start
LH: loop header
LB: loop body
LE: loop exit
PB: predicated region body
PF: predicated region fallthrough
CT: control target
= control target key end

     0   :  { %s1519_s0 = inlined_call_operand.vmem [shape: s32[2], index: 0, kind: input, shape index: {}]   ;;  %s1520_s1 = inlined_call_operand.vmem [shape: f32[2,8,128], index: 1, kind: input, shape index: {}]   ;;  %s1521_s2 = inlined_call_operand.vmem [shape: f32[2,128,8], index: 2, kind: input, shape index: {}]   ;;  %s1522_s3 = inlined_call_operand.vmem [shape: f32[2,8,128], index: 3, kind: output, shape index: {}]  }
   0x1   :  { %s8_s14 = sshll.u32 %s1519_s0, 4  ;;  %s9_s14 = int_to_ptr.vmem [resolvable:$true] %s8_s14 }
   0x2   :  { %s1004_s15 = scalar_lea.vmem %s9_s14, 16  ;;  %p1009_p1 = scmp.lt.s32.totalorder %s9_s14, %s9_s14 }
   0x3   :  { %p1005_p0 = scmp.ne.s32.totalorder %s9_s14, %s1004_s15  ;;  %p1010_p2 = scmp.lt.s32.totalorder %s1004_s15, %s1004_s15 }
   0x5   :  { %p1011_p3 = por %p1010_p2, %p1009_p1 }
   0x7   :  { %p1012_p4 = pnand %p1011_p3, %p1005_p0 }
   0x9   :  { %1015 = shalt.err (!%p1012_p4)  }
   0xa   :  { %s1058_s16 = smov [#allocation4]  }
   0xb   :  { %11 = dma.vmem_to_smem %s9_s14, 16, %s1058_s16, [#allocation3] }
   0xc   :  { %1036 = dma.done.wait [#allocation3], 16 }
   0xd   :  { %1037 = vsyncadd [#allocation3], 4294967280 }
   0xe   :  { %13 = sfence }
   0xf   :  { %s1089_s17 = smov 0  }
  0x10 LB: > { %s1095_s0 = sadd.s32 4294967295, %s1040_s17   ;;  %p918_p5 = scmp.ge.s32.totalorder %s1040_s17, 1  ;;  %s1040_s17 = sphi %s1089_s17, %s19_s17  }
  0x11   : > { %p128_p6 = scmp.lt.s32.totalorder %s1040_s17, 3 }
  0x13   : > { %p129_p7 = pnand %p918_p5, %p128_p6 }
  0x14   : > { %p153_p8 = scmp.lt.s32.totalorder (!%p129_p7), %s1095_s0, 1  ;;  %v1059_v0 = vmov (!%p129_p7), 2   ;;  %v263_v1 = vlaneseq (!%p129_p7)  ;;  %v1060_v19 = vmov (!%p129_p7), 0   ;;  %v1061_v20 = vmov (!%p129_p7), 3   ;;  %s1300_s30 = sld [smem:[#allocation4 + %s1095_s0]] (!%p129_p7) }
  0x15   : > { %132 = sbr.rel (%p129_p7) target bundleno = 559 (0x22f), region = 28  ;;  %995 = vset.pattern.permute.xlu1 (!%p129_p7), %v1059_v0  ;;  %994 = vset.pattern.permute.xlu0 (!%p129_p7), %v1059_v0  ;;  %v1062_v21 = vmov (!%p129_p7), 1   ;;  %v1063_v27 = vmov (!%p129_p7), 4  }
  0x16   : > { %v1104_v2 = vand.u32 (!%p129_p7), 127, %v263_v1  ;;  %v1227_v22 = vshrl.u32 (!%p129_p7), %v263_v1, 7 }
  0x18   : > { %v265_v23 = vsub.s32 (!%p129_p7), 2, %v1227_v22  ;;  %v349_v55 = vsub.s32 (!%p129_p7), 0, %v1227_v22 }
  0x1a   : > { %p939_p9 = scmp.le.s32.totalorder (!%p129_p7), %s1300_s30, 0 }
  0x1c   : > { %s1101_s18 = scalar_select %p153_p8, %s1095_s0, 1 }
  0x1d   : > { %s1503_s4 = smov (!%p939_p9), 0  }
  0x1e   : > { %s943_s19 = sshll.u32 %s1101_s18, 7  ;;  %s919_s20 = sshll.u32 %s1101_s18, 3 }
  0x1f   : > { %s1111_s23 = scalar_lea.vmem %s1521_s2, %s943_s19  ;;  %s1118_s26 = scalar_lea.vmem %s1522_s3, %s919_s20 }
  0x20   : > { %v1121_v3 = vld [vmem:[%s1111_s23 + $0x10] sm:$0xff]  ;;  %v1124_v4 = vld [vmem:[%s1111_s23] sm:$0xff]  ;;  %v1129_v5 = vld [vmem:[%s1111_s23 + $0x18] sm:$0xff]  ;;  %s156_s29 = scalar_lea.vmem %s1520_s1, %s919_s20 }
  0x21   : > { %195 = vperm.xlu1 %995, %v1121_v3   ;;  %185 = vperm.xlu0 %994, %v1124_v4   ;;  %v1132_v6 = vld [vmem:[%s1111_s23 + $0x8] sm:$0xff]  ;;  %v1140_v8 = vld [vmem:[%s1111_s23 + $0x20] sm:$0xff]  ;;  %v1145_v9 = vld [vmem:[%s1111_s23 + $0x38] sm:$0xff] }
  0x22   : > { %v1137_v7 = vld [vmem:[%s1111_s23 + $0x28] sm:$0xff]  ;;  %v1148_v10 = vld [vmem:[%s1111_s23 + $0x30] sm:$0xff]  ;;  %v1156_v12 = vld [vmem:[%s1111_s23 + $0x40] sm:$0xff] }
  0x23   : > { %v1153_v11 = vld [vmem:[%s1111_s23 + $0x48] sm:$0xff]  ;;  %v1161_v13 = vld [vmem:[%s1111_s23 + $0x58] sm:$0xff]  ;;  %v1164_v14 = vld [vmem:[%s1111_s23 + $0x50] sm:$0xff] }
  0x24   : > { %v1169_v15 = vld [vmem:[%s1111_s23 + $0x68] sm:$0xff]  ;;  %v1172_v16 = vld [vmem:[%s1111_s23 + $0x60] sm:$0xff]  ;;  %v1177_v17 = vld [vmem:[%s1111_s23 + $0x78] sm:$0xff] }
  0x25   : > { %200 = vperm.xlu1 %995, %v1129_v5   ;;  %190 = vperm.xlu0 %994, %v1132_v6   ;;  %v1180_v18 = vld [vmem:[%s1111_s23 + $0x70] sm:$0xff]  ;;  %v1237_v24 = vld [vmem:[%s156_s29] sm:$0xff]  }
  0x26   : > { %v1242_v25 = vrot.slane %v1237_v24, %v265_v23  ;;  %v350_v60 = vrot.slane %v1237_v24, %v349_v55 }
  0x29   : > { %210 = vperm.xlu1 %995, %v1137_v7   ;;  %205 = vperm.xlu0 %994, %v1140_v8  }
  0x2d   : > { %220 = vperm.xlu1 %995, %v1145_v9   ;;  %215 = vperm.xlu0 %994, %v1148_v10  }
  0x31   : > { %230 = vperm.xlu1 %995, %v1153_v11   ;;  %225 = vperm.xlu0 %994, %v1156_v12  }
  0x35   : > { %240 = vperm.xlu1 %995, %v1161_v13   ;;  %235 = vperm.xlu0 %994, %v1164_v14  }
  0x39   : > { %250 = vperm.xlu1 %995, %v1169_v15   ;;  %245 = vperm.xlu0 %994, %v1172_v16  }
  0x3d   : > { %260 = vperm.xlu1 %995, %v1177_v17   ;;  %255 = vperm.xlu0 %994, %v1180_v18  }
  0x41   : > { %997 = vset.pattern.permute.xlu1 %v1060_v19  ;;  %996 = vset.pattern.permute.xlu0 %v1060_v19 }
  0x42   : > { %288 = vperm.xlu1 %997, %v1132_v6   ;;  %284 = vperm.xlu0 %996, %v1124_v4  }
  0x46   : > { %292 = vperm.xlu1 %997, %v1121_v3   ;;  %296 = vperm.xlu0 %996, %v1129_v5  }
  0x4a   : > { %300 = vperm.xlu1 %997, %v1140_v8   ;;  %304 = vperm.xlu0 %996, %v1137_v7  }
  0x4e   : > { %308 = vperm.xlu1 %997, %v1148_v10   ;;  %312 = vperm.xlu0 %996, %v1145_v9  }
  0x52   : > { %316 = vperm.xlu1 %997, %v1156_v12   ;;  %320 = vperm.xlu0 %996, %v1153_v11  }
  0x56   : > { %324 = vperm.xlu1 %997, %v1164_v14   ;;  %328 = vperm.xlu0 %996, %v1161_v13  }
  0x5a   : > { %332 = vperm.xlu1 %997, %v1172_v16   ;;  %336 = vperm.xlu0 %996, %v1169_v15  }
  0x5e   : > { %340 = vperm.xlu1 %997, %v1180_v18   ;;  %344 = vperm.xlu0 %996, %v1177_v17  }
  0x62   : > { %998 = vset.pattern.permute.xlu1 %v1061_v20  ;;  %999 = vset.pattern.permute.xlu0 %v1061_v20 }
  0x63   : > { %400 = vperm.xlu1 %998, %v1124_v4   ;;  %404 = vperm.xlu0 %999, %v1132_v6  }
  0x67   : > { %408 = vperm.xlu1 %998, %v1121_v3   ;;  %416 = vperm.xlu0 %999, %v1140_v8  }
  0x6b   : > { %412 = vperm.xlu1 %998, %v1129_v5   ;;  %424 = vperm.xlu0 %999, %v1148_v10  }
  0x6f   : > { %420 = vperm.xlu1 %998, %v1137_v7   ;;  %432 = vperm.xlu0 %999, %v1156_v12  }
  0x73   : > { %428 = vperm.xlu1 %998, %v1145_v9   ;;  %440 = vperm.xlu0 %999, %v1164_v14  }
  0x77   : > { %436 = vperm.xlu1 %998, %v1153_v11   ;;  %448 = vperm.xlu0 %999, %v1172_v16  }
  0x7b   : > { %444 = vperm.xlu1 %998, %v1161_v13   ;;  %456 = vperm.xlu0 %999, %v1180_v18  }
  0x7f   : > { %452 = vperm.xlu1 %998, %v1169_v15   ;;  %1000 = vset.pattern.permute.xlu0 %v1062_v21 }
  0x80   : > { %484 = vperm.xlu0 %1000, %v1124_v4  }
  0x83   : > { %460 = vperm.xlu1 %998, %v1177_v17  }
  0x84   : > { %496 = vperm.xlu0 %1000, %v1129_v5  }
  0x87   : > { %1001 = vset.pattern.permute.xlu1 %v1062_v21 }
  0x88   : > { %488 = vperm.xlu1 %1001, %v1132_v6   ;;  %504 = vperm.xlu0 %1000, %v1137_v7  }
  0x8c   : > { %492 = vperm.xlu1 %1001, %v1121_v3   ;;  %512 = vperm.xlu0 %1000, %v1145_v9  }
  0x90   : > { %500 = vperm.xlu1 %1001, %v1140_v8   ;;  %520 = vperm.xlu0 %1000, %v1153_v11  }
  0x94   : > { %508 = vperm.xlu1 %1001, %v1148_v10   ;;  %528 = vperm.xlu0 %1000, %v1161_v13  }
  0x98   : > { %516 = vperm.xlu1 %1001, %v1156_v12   ;;  %536 = vperm.xlu0 %1000, %v1169_v15  }
  0x9c   : > { %524 = vperm.xlu1 %1001, %v1164_v14   ;;  %544 = vperm.xlu0 %1000, %v1177_v17  }
  0xa0   : > { %v1244_v26 = vpop.permute.xlu1 %195  ;;  %532 = vperm.xlu1 %1001, %v1172_v16   ;;  %1003 = vset.pattern.permute.xlu0 %v1063_v27  ;;  %v186_v28 = vpop.permute.xlu0 %185 }
  0xa1   : > { %v269_v29 = vmin.f32 %v1244_v26, %v1242_v25  ;;  %v267_v30 = vmin.f32 %v186_v28, %v1242_v25  ;;  %620 = vperm.xlu0 %1003, %v1132_v6  }
  0xa4   : > { %v201_v31 = vpop.permute.xlu1 %200  ;;  %540 = vperm.xlu1 %1001, %v1180_v18   ;;  %v191_v32 = vpop.permute.xlu0 %190 }
  0xa5   : > { %v270_v33 = vmin.f32 %v201_v31, %v1242_v25  ;;  %v268_v34 = vmin.f32 %v191_v32, %v1242_v25  ;;  %632 = vperm.xlu0 %1003, %v1140_v8  }
  0xa8   : > { %v211_v35 = vpop.permute.xlu1 %210  ;;  %1002 = vset.pattern.permute.xlu1 %v1063_v27  ;;  %v206_v36 = vpop.permute.xlu0 %205 }
  0xa9   : > { %v272_v37 = vmin.f32 %v211_v35, %v1242_v25  ;;  %v271_v38 = vmin.f32 %v206_v36, %v1242_v25  ;;  %616 = vperm.xlu1 %1002, %v1124_v4   ;;  %640 = vperm.xlu0 %1003, %v1148_v10  }
  0xac   : > { %v221_v39 = vpop.permute.xlu1 %220  ;;  %v216_v40 = vpop.permute.xlu0 %215 }
  0xad   : > { %v274_v41 = vmin.f32 %v221_v39, %v1242_v25  ;;  %v273_v42 = vmin.f32 %v216_v40, %v1242_v25  ;;  %624 = vperm.xlu1 %1002, %v1121_v3   ;;  %648 = vperm.xlu0 %1003, %v1156_v12  }
  0xb0   : > { %v231_v43 = vpop.permute.xlu1 %230  ;;  %v226_v44 = vpop.permute.xlu0 %225 }
  0xb1   : > { %v276_v45 = vmin.f32 %v231_v43, %v1242_v25  ;;  %v275_v46 = vmin.f32 %v226_v44, %v1242_v25  ;;  %628 = vperm.xlu1 %1002, %v1129_v5   ;;  %656 = vperm.xlu0 %1003, %v1164_v14  }
  0xb4   : > { %v241_v47 = vpop.permute.xlu1 %240  ;;  %v236_v48 = vpop.permute.xlu0 %235 }
  0xb5   : > { %v278_v49 = vmin.f32 %v241_v47, %v1242_v25  ;;  %v277_v50 = vmin.f32 %v236_v48, %v1242_v25  ;;  %636 = vperm.xlu1 %1002, %v1137_v7   ;;  %664 = vperm.xlu0 %1003, %v1172_v16  }
  0xb8   : > { %v251_v51 = vpop.permute.xlu1 %250  ;;  %v246_v52 = vpop.permute.xlu0 %245 }
  0xb9   : > { %v280_v53 = vmin.f32 %v251_v51, %v1242_v25  ;;  %v279_v54 = vmin.f32 %v246_v52, %v1242_v25  ;;  %644 = vperm.xlu1 %1002, %v1145_v9   ;;  %672 = vperm.xlu0 %1003, %v1180_v18  }
  0xbc   : > { %v261_v56 = vpop.permute.xlu1 %260  ;;  %v256_v57 = vpop.permute.xlu0 %255 }
  0xbd   : > { %v282_v58 = vmin.f32 %v261_v56, %v1242_v25  ;;  %v281_v59 = vmin.f32 %v256_v57, %v1242_v25  ;;  %652 = vperm.xlu1 %1002, %v1153_v11  }
  0xc1   : > { %v289_v61 = vpop.permute.xlu1 %288  ;;  %660 = vperm.xlu1 %1002, %v1161_v13   ;;  %v285_v62 = vpop.permute.xlu0 %284 }
  0xc2   : > { %v352_v63 = vmax.f32 %v289_v61, %v350_v60  ;;  %v351_v0 = vmax.f32 %v285_v62, %v350_v60 }
  0xc4   : > { %v1281_v1 = vsub.f32 %v268_v34, %v352_v63  ;;  %v1283_v3 = vsub.f32 %v267_v30, %v351_v0 }
  0xc5   : > { %v293_v4 = vpop.permute.xlu1 %292  ;;  %668 = vperm.xlu1 %1002, %v1169_v15   ;;  %v297_v5 = vpop.permute.xlu0 %296 }
  0xc6   : > { %v353_v6 = vmax.f32 %v293_v4, %v350_v60  ;;  %v354_v7 = vmax.f32 %v297_v5, %v350_v60 }
  0xc8   : > { %v1286_v8 = vsub.f32 %v269_v29, %v353_v6  ;;  %v1288_v9 = vsub.f32 %v270_v33, %v354_v7 }
  0xc9   : > { %v301_v10 = vpop.permute.xlu1 %300  ;;  %676 = vperm.xlu1 %1002, %v1177_v17   ;;  %v305_v11 = vpop.permute.xlu0 %304 }
  0xca   : > { %v355_v12 = vmax.f32 %v301_v10, %v350_v60  ;;  %v356_v13 = vmax.f32 %v305_v11, %v350_v60 }
  0xcc   : > { %v1291_v14 = vsub.f32 %v271_v38, %v355_v12  ;;  %v1293_v16 = vsub.f32 %v272_v37, %v356_v13 }
  0xcd   : > { %v309_v18 = vpop.permute.xlu1 %308  ;;  %v313_v15 = vpop.permute.xlu0 %312 }
  0xce   : > { %v357_v19 = vmax.f32 %v309_v18, %v350_v60  ;;  %v358_v20 = vmax.f32 %v313_v15, %v350_v60  ;;  %v383_v18 = vmax.f32 %v1283_v3, 0.0 }
  0xd0   : > { %v1295_v21 = vsub.f32 %v273_v42, %v357_v19  ;;  %v1297_v23 = vsub.f32 %v274_v41, %v358_v20 }
  0xd1   : > { %v317_v25 = vpop.permute.xlu1 %316  ;;  %v321_v26 = vpop.permute.xlu0 %320 }
  0xd2   : > { %v359_v17 = vmax.f32 %v317_v25, %v350_v60  ;;  %v360_v27 = vmax.f32 %v321_v26, %v350_v60 }
  0xd4   : > { %v1302_v28 = vsub.f32 %v275_v46, %v359_v17  ;;  %v1304_v29 = vsub.f32 %v276_v45, %v360_v27  ;;  %v386_v17 = vmax.f32 %v1288_v9, 0.0 }
  0xd5   : > { %v325_v30 = vpop.permute.xlu1 %324  ;;  %v329_v31 = vpop.permute.xlu0 %328 }
  0xd6   : > { %v361_v32 = vmax.f32 %v325_v30, %v350_v60  ;;  %v362_v33 = vmax.f32 %v329_v31, %v350_v60 }
  0xd8   : > { %v1306_v34 = vsub.f32 %v277_v50, %v361_v32  ;;  %v1308_v35 = vsub.f32 %v278_v49, %v362_v33 }
  0xd9   : > { %v333_v36 = vpop.permute.xlu1 %332  ;;  %v337_v37 = vpop.permute.xlu0 %336 }
  0xda   : > { %v363_v38 = vmax.f32 %v333_v36, %v350_v60  ;;  %v364_v39 = vmax.f32 %v337_v37, %v350_v60 }
  0xdc   : > { %v1310_v40 = vsub.f32 %v279_v54, %v363_v38  ;;  %v1312_v41 = vsub.f32 %v280_v53, %v364_v39 }
  0xdd   : > { %v341_v42 = vpop.permute.xlu1 %340  ;;  %v345_v43 = vpop.permute.xlu0 %344 }
  0xde   : > { %v365_v44 = vmax.f32 %v341_v42, %v350_v60  ;;  %v366_v45 = vmax.f32 %v345_v43, %v350_v60  ;;  %v384_v42 = vmax.f32 %v1281_v1, 0.0  ;;  %v388_v43 = vmax.f32 %v1293_v16, 0.0 }
  0xdf   : > { %v385_v1 = vmax.f32 %v1286_v8, 0.0  ;;  %v390_v16 = vmax.f32 %v1297_v23, 0.0  ;;  %v387_v23 = vmax.f32 %v1291_v14, 0.0 }
  0xe0   : > { %v1314_v46 = vsub.f32 %v281_v59, %v365_v44  ;;  %v1316_v47 = vsub.f32 %v282_v58, %v366_v45  ;;  %v465_v58 = vsub.s32 3, %v1227_v22  ;;  %v549_v59 = vsub.s32 1, %v1227_v22 }
  0xe2   : > { %v401_v48 = vpop.permute.xlu1 %400  ;;  %v405_v50 = vpop.permute.xlu0 %404  ;;  %v1335_v0 = vrot.slane %v1237_v24, %v465_v58  ;;  %v1338_v4 = vrot.slane %v1237_v24, %v549_v59 }
  0xe4   : > { %v467_v7 = vmin.f32 %v401_v48, %v1335_v0  ;;  %v468_v27 = vmin.f32 %v405_v50, %v1335_v0 }
  0xe6   : > { %v409_v49 = vpop.permute.xlu1 %408  ;;  %v1318_v51 = vpop.permute.xlu0 %416 }
  0xe7   : > { %v469_v9 = vmin.f32 %v409_v49, %v1335_v0  ;;  %v471_v49 = vmin.f32 %v1318_v51, %v1335_v0  ;;  %v392_v51 = vmax.f32 %v1304_v29, 0.0  ;;  %v389_v29 = vmax.f32 %v1295_v21, 0.0 }
  0xea   : > { %v413_v52 = vpop.permute.xlu1 %412  ;;  %v1320_v55 = vpop.permute.xlu0 %424 }
  0xeb   : > { %v470_v15 = vmin.f32 %v413_v52, %v1335_v0 }
  0xee   : > { %v421_v54 = vpop.permute.xlu1 %420  ;;  %v1322_v56 = vpop.permute.xlu0 %432 }
  0xef   : > { %v472_v32 = vmin.f32 %v421_v54, %v1335_v0 }
  0xf2   : > { %v429_v53 = vpop.permute.xlu1 %428  ;;  %v1324_v57 = vpop.permute.xlu0 %440 }
  0xf3   : > { %v474_v44 = vmin.f32 %v429_v53, %v1335_v0 }
  0xf6   : > { %v437_v61 = vpop.permute.xlu1 %436  ;;  %v1326_v60 = vpop.permute.xlu0 %448 }
  0xf7   : > { %v476_v53 = vmin.f32 %v437_v61, %v1335_v0  ;;  %v473_v61 = vmin.f32 %v1320_v55, %v1335_v0  ;;  %v394_v55 = vmax.f32 %v1308_v35, 0.0 }
  0xfa   : > { %v1330_v62 = vpop.permute.xlu1 %444  ;;  %v1332_v63 = vpop.permute.xlu0 %456 }
  0xfe   : > { %v1340_v5 = vpop.permute.xlu1 %452 }
  0xff   : > { %v485_v6 = vpop.permute.xlu0 %484 }
 0x100   : > { %v551_v10 = vmax.f32 %v485_v6, %v1338_v4 }
 0x102   : > { %v567_v11 = vsub.f32 %v467_v7, %v551_v10  ;;  %v1344_v12 = vpop.permute.xlu1 %460 }
 0x103   : > { %v497_v13 = vpop.permute.xlu0 %496 }
 0x104   : > { %v583_v19 = vmax.f32 %v567_v11, 0.0  ;;  %v554_v20 = vmax.f32 %v497_v13, %v1338_v4 }
 0x106   : > { %v570_v25 = vsub.f32 %v470_v15, %v554_v20  ;;  %v1349_v26 = vmul.f32 %v583_v19, %v383_v18 }
 0x107   : > { %v489_v30 = vpop.permute.xlu1 %488  ;;  %v505_v31 = vpop.permute.xlu0 %504 }
 0x108   : > { %v586_v33 = vmax.f32 %v570_v25, 0.0  ;;  %v552_v36 = vmax.f32 %v489_v30, %v1338_v4  ;;  %v556_v3 = vmax.f32 %v505_v31, %v1338_v4  ;;  %v478_v30 = vmin.f32 %v1330_v62, %v1335_v0 }
 0x109   : > { %v475_v62 = vmin.f32 %v1322_v56, %v1335_v0  ;;  %v391_v56 = vmax.f32 %v1302_v28, 0.0 }
 0x10a   : > { %v568_v37 = vsub.f32 %v468_v27, %v552_v36  ;;  %v572_v38 = vsub.f32 %v472_v32, %v556_v3  ;;  %v1356_v39 = vmul.f32 %v586_v33, %v386_v17 }
 0x10b   : > { %v493_v45 = vpop.permute.xlu1 %492  ;;  %v513_v48 = vpop.permute.xlu0 %512 }
 0x10c   : > { %v584_v50 = vmax.f32 %v568_v37, 0.0  ;;  %v588_v52 = vmax.f32 %v572_v38, 0.0  ;;  %v553_v54 = vmax.f32 %v493_v45, %v1338_v4  ;;  %v558_v58 = vmax.f32 %v513_v48, %v1338_v4 }
 0x10e   : > { %v569_v59 = vsub.f32 %v469_v9, %v553_v54  ;;  %v574_v6 = vsub.f32 %v474_v44, %v558_v58  ;;  %v1364_v7 = vmul.f32 %v584_v50, %v384_v42  ;;  %v1366_v10 = vmul.f32 %v588_v52, %v388_v43 }
 0x10f   : > { %v501_v11 = vpop.permute.xlu1 %500  ;;  %v521_v13 = vpop.permute.xlu0 %520  ;;  %v480_v9 = vmin.f32 %v1340_v5, %v1335_v0  ;;  %v681_v58 = vsub.s32 4, %v1227_v22  ;;  %v396_v5 = vmax.f32 %v1312_v41, 0.0 }
 0x110   : > { %v585_v18 = vmax.f32 %v569_v59, 0.0  ;;  %v590_v15 = vmax.f32 %v574_v6, 0.0  ;;  %v555_v19 = vmax.f32 %v501_v11, %v1338_v4  ;;  %v560_v20 = vmax.f32 %v521_v13, %v1338_v4 }
 0x112   : > { %v571_v25 = vsub.f32 %v471_v49, %v555_v19  ;;  %v576_v17 = vsub.f32 %v476_v53, %v560_v20  ;;  %v1375_v27 = vmul.f32 %v585_v18, %v385_v1  ;;  %v1377_v8 = vmul.f32 %v590_v15, %v390_v16 }
 0x113   : > { %v509_v31 = vpop.permute.xlu1 %508  ;;  %v529_v32 = vpop.permute.xlu0 %528  ;;  %v477_v1 = vmin.f32 %v1324_v57, %v1335_v0  ;;  %v482_v16 = vmin.f32 %v1344_v12, %v1335_v0  ;;  %v1413_v15 = vrot.slane %v1237_v24, %v681_v58  ;;  %v393_v57 = vmax.f32 %v1306_v34, 0.0 }
 0x114   : > { %v587_v33 = vmax.f32 %v571_v25, 0.0  ;;  %v592_v36 = vmax.f32 %v576_v17, 0.0  ;;  %v557_v3 = vmax.f32 %v509_v31, %v1338_v4  ;;  %v562_v37 = vmax.f32 %v529_v32, %v1338_v4 }
 0x115   : > { %v398_v12 = vmax.f32 %v1316_v47, 0.0  ;;  %v479_v17 = vmin.f32 %v1326_v60, %v1335_v0  ;;  %v395_v47 = vmax.f32 %v1310_v40, 0.0  ;;  %v481_v60 = vmin.f32 %v1332_v63, %v1335_v0 }
 0x116   : > { %v573_v38 = vsub.f32 %v473_v61, %v557_v3  ;;  %v578_v42 = vsub.f32 %v478_v30, %v562_v37  ;;  %v1387_v43 = vmul.f32 %v587_v33, %v387_v23  ;;  %v1389_v14 = vmul.f32 %v592_v36, %v392_v51 }
 0x117   : > { %v517_v44 = vpop.permute.xlu1 %516  ;;  %v537_v45 = vpop.permute.xlu0 %536  ;;  %v1064_v40 = vmov 0.0  }
 0x118   : > { %v589_v48 = vmax.f32 %v573_v38, 0.0  ;;  %v594_v50 = vmax.f32 %v578_v42, 0.0  ;;  %v559_v52 = vmax.f32 %v517_v44, %v1338_v4  ;;  %v564_v54 = vmax.f32 %v537_v45, %v1338_v4 }
 0x119   : > { %v397_v45 = vmax.f32 %v1314_v46, 0.0 }
 0x11a   : > { %v575_v59 = vsub.f32 %v475_v62, %v559_v52  ;;  %v580_v21 = vsub.f32 %v480_v9, %v564_v54  ;;  %v1400_v6 = vmul.f32 %v589_v48, %v389_v29  ;;  %v1402_v35 = vmul.f32 %v594_v50, %v394_v55 }
 0x11b   : > { %v525_v49 = vpop.permute.xlu1 %524  ;;  %v545_v53 = vpop.permute.xlu0 %544 }
 0x11c   : > { %v591_v11 = vmax.f32 %v575_v59, 0.0  ;;  %v596_v22 = vmax.f32 %v580_v21, 0.0  ;;  %v561_v13 = vmax.f32 %v525_v49, %v1338_v4  ;;  %v566_v18 = vmax.f32 %v545_v53, %v1338_v4 }
 0x11e   : > { %v577_v28 = vsub.f32 %v477_v1, %v561_v13  ;;  %v582_v19 = vsub.f32 %v482_v16, %v566_v18  ;;  %v1415_v41 = vmul.f32 %v591_v11, %v391_v56  ;;  %v1417_v20 = vmul.f32 %v596_v22, %v396_v5 }
 0x11f   : > { %v533_v25 = vpop.permute.xlu1 %532 }
 0x120   : > { %v593_v23 = vmax.f32 %v577_v28, 0.0  ;;  %v598_v51 = vmax.f32 %v582_v19, 0.0  ;;  %v563_v61 = vmax.f32 %v533_v25, %v1338_v4  ;;  %v621_v30 = vpop.permute.xlu0 %620 }
 0x121   : > { %v684_v31 = vadd.f32 %v1413_v15, %v621_v30 }
 0x122   : > { %v579_v32 = vsub.f32 %v479_v17, %v563_v61  ;;  %v1425_v33 = vmul.f32 %v593_v23, %v393_v57  ;;  %v1427_v36 = vmul.f32 %v598_v51, %v398_v12 }
 0x123   : > { %v700_v34 = vsub.f32 %v684_v31, %v1364_v7  ;;  %v541_v3 = vpop.permute.xlu1 %540 }
 0x124   : > { %v595_v37 = vmax.f32 %v579_v32, 0.0  ;;  %v565_v38 = vmax.f32 %v541_v3, %v1338_v4  ;;  %v633_v42 = vpop.permute.xlu0 %632 }
 0x125   : > { %v716_v29 = vmul.f32 0.45, %v700_v34  ;;  %v687_v55 = vadd.f32 %v1413_v15, %v633_v42 }
 0x126   : > { %v581_v62 = vsub.f32 %v481_v60, %v565_v38  ;;  %v1435_v9 = vmul.f32 %v595_v37, %v395_v47 }
 0x127   : > { %vm732_vm0 = vcmp.gt.f32.partialorder %v1364_v7, %v716_v29  ;;  %v703_v44 = vsub.f32 %v687_v55, %v1387_v43 }
 0x128   : > { %v924_v48 = vsel %vm732_vm0, 1.0, %v1064_v40  ;;  %v597_v63 = vmax.f32 %v581_v62, 0.0  ;;  %v617_v0 = vpop.permute.xlu1 %616  ;;  %v641_v50 = vpop.permute.xlu0 %640 }
 0x129   : > { %780 = vst [vmem:[#allocation2 + $0x8] sm:$0xff] %v924_v48  ;;  %v719_v4 = vmul.f32 0.45, %v703_v44  ;;  %v683_v52 = vadd.f32 %v1413_v15, %v617_v0  ;;  %v689_v54 = vadd.f32 %v1413_v15, %v641_v50 }
 0x12a   : > { %v1443_v58 = vmul.f32 %v597_v63, %v397_v45 }
 0x12b   : > { %vm735_vm1 = vcmp.gt.f32.partialorder %v1387_v43, %v719_v4  ;;  %v699_v7 = vsub.f32 %v683_v52, %v1349_v26  ;;  %v705_v46 = vsub.f32 %v689_v54, %v1400_v6 }
 0x12c   : > { %v927_v59 = vsel %vm735_vm1, 1.0, %v1064_v40  ;;  %v625_v21 = vpop.permute.xlu1 %624  ;;  %v649_v56 = vpop.permute.xlu0 %648 }
 0x12d   : > { %783 = vst [vmem:[#allocation2 + $0x20] sm:$0xff] %v927_v59  ;;  %v715_v5 = vmul.f32 0.45, %v699_v7  ;;  %v721_v1 = vmul.f32 0.45, %v705_v46  ;;  %v685_v16 = vadd.f32 %v1413_v15, %v625_v21  ;;  %v691_v49 = vadd.f32 %v1413_v15, %v649_v56 }
 0x12f   : > { %vm731_vm2 = vcmp.gt.f32.partialorder %v1349_v26, %v715_v5  ;;  %vm737_vm3 = vcmp.gt.f32.partialorder %v1400_v6, %v721_v1  ;;  %v701_v43 = vsub.f32 %v685_v16, %v1375_v27  ;;  %v707_v53 = vsub.f32 %v691_v49, %v1415_v41 }
 0x130   : > { %v923_v11 = vsel %vm731_vm2, 1.0, %v1064_v40  ;;  %v929_v22 = vsel %vm737_vm3, 1.0, %v1064_v40  ;;  %v629_v13 = vpop.permute.xlu1 %628  ;;  %v657_v18 = vpop.permute.xlu0 %656 }
 0x131   : > { %779 = vst [vmem:[#allocation2] sm:$0xff] %v923_v11  ;;  %785 = vst [vmem:[#allocation2 + $0x30] sm:$0xff] %v929_v22  ;;  %v717_v28 = vmul.f32 0.45, %v701_v43  ;;  %v723_v19 = vmul.f32 0.45, %v707_v53  ;;  %v686_v57 = vadd.f32 %v1413_v15, %v629_v13  ;;  %v693_v26 = vadd.f32 %v1413_v15, %v657_v18 }
 0x132   : > { %v1054_v43 = vmov 0.0   ;;  %v1042_v53 = vmov (!%p939_p9), 0.0  }
 0x133   : > { %vm733_vm4 = vcmp.gt.f32.partialorder %v1375_v27, %v717_v28  ;;  %vm739_vm5 = vcmp.gt.f32.partialorder %v1415_v41, %v723_v19  ;;  %v702_v6 = vsub.f32 %v686_v57, %v1356_v39  ;;  %v709_v12 = vsub.f32 %v693_v26, %v1425_v33 }
 0x134   : > { %v925_v25 = vsel %vm733_vm4, 1.0, %v1064_v40  ;;  %v931_v17 = vsel %vm739_vm5, 1.0, %v1064_v40  ;;  %v637_v23 = vpop.permute.xlu1 %636  ;;  %v665_v51 = vpop.permute.xlu0 %664 }
 0x135   : > { %781 = vst [vmem:[#allocation2 + $0x10] sm:$0xff] %v925_v25  ;;  %787 = vst [vmem:[#allocation2 + $0x40] sm:$0xff] %v931_v17  ;;  %v718_v61 = vmul.f32 0.45, %v702_v6  ;;  %v725_v30 = vmul.f32 0.45, %v709_v12  ;;  %v688_v31 = vadd.f32 %v1413_v15, %v637_v23  ;;  %v695_v27 = vadd.f32 %v1413_v15, %v665_v51 }
 0x137   : > { %vm734_vm6 = vcmp.gt.f32.partialorder %v1356_v39, %v718_v61  ;;  %vm741_vm7 = vcmp.gt.f32.partialorder %v1425_v33, %v725_v30  ;;  %v704_v41 = vsub.f32 %v688_v31, %v1366_v10  ;;  %v711_v32 = vsub.f32 %v695_v27, %v1435_v9 }
 0x138   : > { %v926_v34 = vsel %vm734_vm6, 1.0, %v1064_v40  ;;  %v933_v3 = vsel %vm741_vm7, 1.0, %v1064_v40  ;;  %v645_v47 = vpop.permute.xlu1 %644  ;;  %v673_v60 = vpop.permute.xlu0 %672 }
 0x139   : > { %782 = vst [vmem:[#allocation2 + $0x18] sm:$0xff] %v926_v34  ;;  %789 = vst [vmem:[#allocation2 + $0x50] sm:$0xff] %v933_v3  ;;  %v720_v37 = vmul.f32 0.45, %v704_v41  ;;  %v727_v38 = vmul.f32 0.45, %v711_v32  ;;  %v690_v42 = vadd.f32 %v1413_v15, %v645_v47  ;;  %v697_v39 = vadd.f32 %v1413_v15, %v673_v60 }
 0x13b   : > { %vm736_vm8 = vcmp.gt.f32.partialorder %v1366_v10, %v720_v37  ;;  %vm743_vm9 = vcmp.gt.f32.partialorder %v1435_v9, %v727_v38  ;;  %v706_v33 = vsub.f32 %v690_v42, %v1377_v8  ;;  %v713_v29 = vsub.f32 %v697_v39, %v1443_v58 }
 0x13c   : > { %v928_v55 = vsel %vm736_vm8, 1.0, %v1064_v40  ;;  %v935_v62 = vsel %vm743_vm9, 1.0, %v1064_v40  ;;  %v653_v44 = vpop.permute.xlu1 %652 }
 0x13d   : > { %784 = vst [vmem:[#allocation2 + $0x28] sm:$0xff] %v928_v55  ;;  %791 = vst [vmem:[#allocation2 + $0x60] sm:$0xff] %v935_v62  ;;  %v722_v45 = vmul.f32 0.45, %v706_v33  ;;  %v729_v48 = vmul.f32 0.45, %v713_v29  ;;  %v692_v63 = vadd.f32 %v1413_v15, %v653_v44 }
 0x13f   : > { %vm738_vm10 = vcmp.gt.f32.partialorder %v1377_v8, %v722_v45  ;;  %vm745_vm11 = vcmp.gt.f32.partialorder %v1443_v58, %v729_v48  ;;  %v708_v10 = vsub.f32 %v692_v63, %v1389_v14 }
 0x140   : > { %v930_v9 = vsel %vm738_vm10, 1.0, %v1064_v40  ;;  %v937_v0 = vsel %vm745_vm11, 1.0, %v1064_v40  ;;  %v661_v50 = vpop.permute.xlu1 %660 }
 0x141   : > { %786 = vst [vmem:[#allocation2 + $0x38] sm:$0xff] %v930_v9  ;;  %793 = vst [vmem:[#allocation2 + $0x70] sm:$0xff] %v937_v0  ;;  %v724_v4 = vmul.f32 0.45, %v708_v10  ;;  %v694_v52 = vadd.f32 %v1413_v15, %v661_v50 }
 0x143   : > { %vm740_vm12 = vcmp.gt.f32.partialorder %v1389_v14, %v724_v4  ;;  %v710_v54 = vsub.f32 %v694_v52, %v1402_v35 }
 0x144   : > { %v932_v8 = vsel %vm740_vm12, 1.0, %v1064_v40  ;;  %v669_v7 = vpop.permute.xlu1 %668 }
 0x145   : > { %788 = vst [vmem:[#allocation2 + $0x48] sm:$0xff] %v932_v8  ;;  %v726_v58 = vmul.f32 0.45, %v710_v54  ;;  %v696_v46 = vadd.f32 %v1413_v15, %v669_v7 }
 0x147   : > { %vm742_vm13 = vcmp.gt.f32.partialorder %v1402_v35, %v726_v58  ;;  %v712_v59 = vsub.f32 %v696_v46, %v1417_v20 }
 0x148   : > { %v934_v21 = vsel %vm742_vm13, 1.0, %v1064_v40  ;;  %v677_v56 = vpop.permute.xlu1 %676 }
 0x149   : > { %790 = vst [vmem:[#allocation2 + $0x58] sm:$0xff] %v934_v21  ;;  %v728_v5 = vmul.f32 0.45, %v712_v59  ;;  %v698_v14 = vadd.f32 %v1413_v15, %v677_v56  ;;  %v1046_v15 = vmov (!%p939_p9), %v1237_v24  }
 0x14b   : > { %vm744_vm14 = vcmp.gt.f32.partialorder %v1417_v20, %v728_v5  ;;  %v714_v1 = vsub.f32 %v698_v14, %v1427_v36  ;;  %881 = sbr.rel (%p939_p9) target bundleno = 558 (0x22e), region = 63 }
 0x14c   : > { %v936_v16 = vsel %vm744_vm14, 1.0, %v1064_v40 }
 0x14d   : > { %792 = vst [vmem:[#allocation2 + $0x68] sm:$0xff] %v936_v16  ;;  %v730_v49 = vmul.f32 0.45, %v714_v1 }
 0x14f   : > { %vm746_vm15 = vcmp.gt.f32.partialorder %v1427_v36, %v730_v49 }
 0x150   : > { %v938_v35 = vsel %vm746_vm15, 1.0, %v1064_v40 }
 0x151   : > { %794 = vst [vmem:[#allocation2 + $0x78] sm:$0xff] %v938_v35 }
 0x152 LB: >> { %v806_v20 = vstv %s1052_s4  ;;  %v1065_v36 = vmov 0.0   ;;  %vm814_vm1 = vcmask 1040384   ;;  %s828_s5 = scalar_lea.vmem [#allocation2], %s1052_s4  ;;  %s801_s4 = sadd.s32 1, %s1052_s4   ;;  %s1052_s4 = sphi %s1503_s4, %s801_s4   ;;  %v1048_v15 = vphi %v1046_v15, %v835_v15   ;;  %v1044_v53 = vphi %v1042_v53, %v1043_v53  }
 0x153   : >> { %vm807_vm0 = vcmp.eq.s32.totalorder %v1104_v2, %v806_v20  ;;  %p800_p10 = scmp.ge.s32.totalorder %s801_s4, %s1300_s30 }
 0x154   : >> { %v940_v40 = vsel %vm807_vm0, 1.0, %v1065_v36 }
 0x155   : >> { %v810_v11 = vmul.f32 %v1048_v15, %v940_v40 }
 0x157   : >> { %v812_v22 = vrot.slane %v810_v11, 5 }
 0x158   : >> { %v829_v12 = vld [vmem:[%s828_s5] sm:$0x1] }
 0x159   : >> { %v815_v24 = vsel %vm814_vm1, %v812_v22, 0.0 }
 0x15a   : >> { %816 = vadd.xlane.f32.xlu0 %v815_v24 }
 0x1e7   : >> { %v817_v13 = vpop.xlane.xlu0 %816 }
 0x1e8   : >> { %v818_v18 = vrot.slane %v817_v13, 4 }
 0x1ea   : >> { %v819_v28 = vadd.f32 %v818_v18, %v817_v13 }
 0x1ec   : >> { %v820_v19 = vrot.slane %v819_v28, 2 }
 0x1ee   : >> { %v821_v57 = vadd.f32 %v820_v19, %v819_v28 }
 0x1f0   : >> { %v822_v26 = vrot.slane %v821_v57, 1 }
 0x1f2   : >> { %v823_v6 = vadd.f32 %v822_v26, %v821_v57 }
 0x1f4   : >> { %944 = vpush %v823_v6 }
 0x225   : >> { %s945_s6 = spop %944 }
 0x226   : >> { %v825_v25 = vstv %s945_s6 }
 0x227   : >> { %v826_v17 = vmul.f32 %v940_v40, %v825_v25  ;;  %v830_v23 = vmul.f32 %v829_v12, %v825_v25  ;;  %803 = sbr.rel (!%p800_p10) target bundleno = 338 (0x152), region = 69 }
 0x229   : >> { %v827_v51 = vadd.f32 %v1044_v53, %v826_v17   ;;  %v831_v61 = vsub.f32 1.0, %v830_v23 }
 0x22b   : >> { %v833_v30 = vrot.slane %v831_v61, 3  ;;  %v1043_v53 = vmov %v827_v51   ;;  %v1055_v43 = vmov (%p800_p10), %v827_v51  }
 0x22d   : >> { %v835_v15 = vmul.f32 %v1048_v15, %v833_v30  }
 0x22e PF: > { %836 = vst [vmem:[%s1118_s26] sm:$0xff] %v1056_v43  ;;  %v1056_v43 = vphi %v1054_v43, %v1055_v43  }
 0x22f PF: > { %s19_s17 = sadd.s32 1, %s1040_s17  }
 0x230   : > { %p16_p11 = scmp.ge.s32.totalorder %s19_s17, 4  }
 0x232   :  { %18 = sbr.rel (!%p16_p11) target bundleno = 16 (0x10), region = 80 }

</bundles_post_ra>
